<compile_context>
chip_gen: v7x
topology: tpu7x:2x2x1
jax: 0.10.0
libtpu: 0.0.40
codegen_flags: <defaults>
</compile_context>

<pallas_src>
import functools
import math

import jax
import jax.numpy as jnp
from jax.experimental import pallas as pl
from jax.experimental.pallas import tpu as pltpu

SCALING_FACTOR = 0.18215
ALPHA_PROD = 0.7  # TODO(synk): real DDPMScheduler alphas_cumprod[t=99] not reproduced.

_VMEM_LIMIT = 32 * 1024 * 1024  # explicit scoped-VMEM budget (safe on v5e/v6e/v7x)


def _round_up(x, m):
    return (x + m - 1) // m * m


# ----------------------------------------------------------------------------
# Fused, tiled GEMM kernel: (M,K) @ (K,N) + bias [+ epilogue]
# ----------------------------------------------------------------------------
def _mm_kernel(*refs, activation, has_res, c1, c2):
    if has_res:
        a_ref, b_ref, bias_ref, res_ref, o_ref, acc_ref = refs
    else:
        a_ref, b_ref, bias_ref, o_ref, acc_ref = refs
        res_ref = None

    @pl.when(pl.program_id(2) == 0)
    def _init():
        acc_ref[...] = jnp.zeros_like(acc_ref)

    acc_ref[...] += jnp.dot(a_ref[...], b_ref[...],
                            preferred_element_type=jnp.float32)

    @pl.when(pl.program_id(2) == pl.num_programs(2) - 1)
    def _epilogue():
        acc = acc_ref[...] + bias_ref[...]           # bias stays f32 in-kernel
        if activation == "silu":
            acc = acc * jax.nn.sigmoid(acc)
        elif activation == "clamp":
            acc = jnp.clip(acc, -1.0, 1.0)
        if activation == "sched":
            # fused 1-step scheduler: (sample - sqrt(1-a)*eps)/sqrt(a) * inv_scale
            acc = (res_ref[...] - c1 * acc) * c2
        elif has_res:
            acc = acc + res_ref[...]
        o_ref[...] = acc.astype(o_ref.dtype)


def pallas_matmul(a, b, bias=None, activation="none", residual=None,
                  alpha_prod=None, inv_scale=None):
    """(M,K) @ (K,N) + bias with fused SiLU / clamp / residual / sched epilogue."""
    M, K = a.shape
    K2, N = b.shape
    assert K == K2

    # Tile selection: lane-dense N (multiple of 128), M tiled in <=256 chunks,
    # K streamed in 512 chunks only when large (single block otherwise -> no
    # padding of the big im2col operand).
    tm = min(256, _round_up(M, 8))
    Mp = _round_up(M, tm)
    tn = min(256, _round_up(N, 128))
    Np = _round_up(N, tn)
    if K <= 1024:
        tk, Kp = K, K
    else:
        tk = 512
        Kp = _round_up(K, tk)

    # MXU inputs in bf16; bias / accumulation / epilogue in f32 (v5e-safe).
    a_p = jnp.pad(a.astype(jnp.bfloat16), ((0, Mp - M), (0, Kp - K)))
    b_p = jnp.pad(b.astype(jnp.bfloat16), ((0, Kp - K), (0, Np - N)))
    if bias is None:
        bias_p = jnp.zeros((1, Np), jnp.float32)
    else:
        bias_p = jnp.pad(bias.reshape(1, N).astype(jnp.float32),
                         ((0, 0), (0, Np - N)))

    has_res = residual is not None
    operands = [a_p, b_p, bias_p]
    in_specs = [
        pl.BlockSpec((tm, tk), lambda i, j, k: (i, k)),
        pl.BlockSpec((tk, tn), lambda i, j, k: (k, j)),
        pl.BlockSpec((1, tn), lambda i, j, k: (0, j)),
    ]
    if has_res:
        res_p = jnp.pad(residual.astype(jnp.float32),
                        ((0, Mp - M), (0, Np - N)))
        operands.append(res_p)
        in_specs.append(pl.BlockSpec((tm, tn), lambda i, j, k: (i, j)))

    if activation == "sched":
        c1 = math.sqrt(1.0 - float(alpha_prod))
        c2 = float(inv_scale) / math.sqrt(float(alpha_prod))
    else:
        c1 = c2 = 0.0

    kernel = functools.partial(_mm_kernel, activation=activation,
                               has_res=has_res, c1=c1, c2=c2)
    out = pl.pallas_call(
        kernel,
        out_shape=jax.ShapeDtypeStruct((Mp, Np), jnp.float32),
        grid=(Mp // tm, Np // tn, Kp // tk),
        in_specs=in_specs,
        out_specs=pl.BlockSpec((tm, tn), lambda i, j, k: (i, j)),
        scratch_shapes=[pltpu.VMEM((tm, tn), jnp.float32)],
        compiler_params=pltpu.CompilerParams(
            dimension_semantics=("parallel", "parallel", "arbitrary"),
            vmem_limit_bytes=_VMEM_LIMIT),
    )(*operands)
    return out[:M, :N]


# ----------------------------------------------------------------------------
# Cross-attention kernel (padded to 128 lanes, masked softmax, EUP reciprocal)
# ----------------------------------------------------------------------------
def _attn_kernel(q_ref, k_ref, v_ref, mask_ref, o_ref, *, scale):
    q = q_ref[0]                                     # (Sqp, Dp) bf16
    k = k_ref[0]                                     # (Skp, Dp) bf16
    v = v_ref[0]
    s = jax.lax.dot_general(q, k, (((1,), (1,)), ((), ())),
                            preferred_element_type=jnp.float32)
    s = s * scale + mask_ref[...]                    # -inf bias on padded keys
    m = jnp.max(s, axis=-1, keepdims=True)
    p = jnp.exp(s - m)
    denom = jnp.sum(p, axis=-1, keepdims=True)
    p = p * pl.reciprocal(denom, approx=True)        # EUP, not VPU divide
    o = jnp.dot(p.astype(v.dtype), v, preferred_element_type=jnp.float32)
    o_ref[0] = o.astype(o_ref.dtype)


def pallas_attention(q, k, v):
    """Batched cross-attention; one grid step per batch element (parallel)."""
    B, Sq, D = q.shape
    _, Sk, _ = k.shape
    Dp = _round_up(D, 128)
    Skp = _round_up(Sk, 128)
    Sqp = _round_up(Sq, 8)
    qp = jnp.pad(q.astype(jnp.bfloat16), ((0, 0), (0, Sqp - Sq), (0, Dp - D)))
    kp = jnp.pad(k.astype(jnp.bfloat16), ((0, 0), (0, Skp - Sk), (0, Dp - D)))
    vp = jnp.pad(v.astype(jnp.bfloat16), ((0, 0), (0, Skp - Sk), (0, Dp - D)))
    mask = jnp.where(jnp.arange(Skp) < Sk, 0.0, -1e30).astype(jnp.float32)
    mask = mask.reshape(1, Skp)
    kernel = functools.partial(_attn_kernel, scale=1.0 / math.sqrt(D))
    out = pl.pallas_call(
        kernel,
        out_shape=jax.ShapeDtypeStruct((B, Sqp, Dp), jnp.float32),
        grid=(B,),
        in_specs=[
            pl.BlockSpec((1, Sqp, Dp), lambda b: (b, 0, 0)),
            pl.BlockSpec((1, Skp, Dp), lambda b: (b, 0, 0)),
            pl.BlockSpec((1, Skp, Dp), lambda b: (b, 0, 0)),
            pl.BlockSpec((1, Skp), lambda b: (0, 0)),
        ],
        out_specs=pl.BlockSpec((1, Sqp, Dp), lambda b: (b, 0, 0)),
        compiler_params=pltpu.CompilerParams(
            dimension_semantics=("parallel",),
            vmem_limit_bytes=_VMEM_LIMIT),
    )(qp, kp, vp, mask)
    return out[:, :Sq, :D]


# ----------------------------------------------------------------------------
# Lane-dense elementwise blend (noise_map mix in the stochastic path)
# ----------------------------------------------------------------------------
def _blend_kernel(a_ref, b_ref, o_ref, *, r):
    o_ref[...] = (a_ref[...] * (1.0 - r) + b_ref[...] * r).astype(o_ref.dtype)


def pallas_blend(a, b, r):
    """a*(1-r) + b*r over a lane-dense (rows, 128) view (f32 elementwise)."""
    shape, total = a.shape, a.size
    pad = (-total) % 128
    af = jnp.pad(a.reshape(-1).astype(jnp.float32), (0, pad)).reshape(-1, 128)
    bf = jnp.pad(b.reshape(-1).astype(jnp.float32), (0, pad)).reshape(-1, 128)
    rows = af.shape[0]
    out = pl.pallas_call(
        functools.partial(_blend_kernel, r=float(r)),
        out_shape=jax.ShapeDtypeStruct((rows, 128), jnp.float32),
        grid=(1,),
        in_specs=[pl.BlockSpec((rows, 128), lambda i: (0, 0)),
                  pl.BlockSpec((rows, 128), lambda i: (0, 0))],
        out_specs=pl.BlockSpec((rows, 128), lambda i: (0, 0)),
        compiler_params=pltpu.CompilerParams(vmem_limit_bytes=_VMEM_LIMIT),
    )(af, bf)
    return out.reshape(-1)[:total].reshape(shape).astype(a.dtype)


# ----------------------------------------------------------------------------
# Conv glue (bf16 im2col in plain JAX, fused tiled GEMM in Pallas)
# ----------------------------------------------------------------------------
def _im2col(x, kh, kw, stride, padding):
    # x: (B, H, W, C) NHWC.  Cols are materialized in bf16 (half HBM traffic).
    B, H, W, C = x.shape
    xp = jnp.pad(x, ((0, 0), (padding, padding), (padding, padding), (0, 0)))
    Ho = (H + 2 * padding - kh) // stride + 1
    Wo = (W + 2 * padding - kw) // stride + 1
    cols = []
    for i in range(kh):
        for j in range(kw):
            cols.append(xp[:, i:i + stride * Ho:stride, j:j + stride * Wo:stride, :])
    cols = jnp.concatenate(cols, axis=-1)            # (B, Ho, Wo, kh*kw*C)
    return cols.reshape(B * Ho * Wo, kh * kw * C), (B, Ho, Wo)


def conv2d(x, w, b=None, stride=1, padding=1, activation="none",
           extra_bias=None, residual=None, alpha_prod=None, inv_scale=None):
    """x NHWC, w in PyTorch layout (Cout, Cin, kh, kw).
    # TODO(synk): fully in-kernel im2col (halo BlockSpecs) would remove the
    # kh*kw HBM amplification; here the cols are at least emitted in bf16."""
    Cout, Cin, kh, kw = w.shape
    cols, (B, Ho, Wo) = _im2col(x.astype(jnp.bfloat16), kh, kw, stride, padding)
    wm = jnp.transpose(w, (2, 3, 1, 0)).reshape(kh * kw * Cin, Cout)
    bias = b
    if extra_bias is not None:
        bias = extra_bias if bias is None else bias + extra_bias
    res = None if residual is None else residual.reshape(B * Ho * Wo, Cout)
    out = pallas_matmul(cols, wm, bias, activation, residual=res,
                        alpha_prod=alpha_prod, inv_scale=inv_scale)
    return out.reshape(B, Ho, Wo, Cout)


def upsample2x(x):
    return jnp.repeat(jnp.repeat(x, 2, axis=1), 2, axis=2)


# ----------------------------------------------------------------------------
# Synthetic sub-networks (same dataflow as the reference forward)
# ----------------------------------------------------------------------------
def text_encoder(p, tokens):
    # TODO(synk): CLIP tokenizer + CLIPTextModel replaced by embedding + linear.
    B, S = tokens.shape
    emb = p["tok_emb"][tokens] + p["pos_emb"][None, :S, :]
    D = emb.shape[-1]
    h = pallas_matmul(emb.reshape(B * S, D), p["W"], p["b"])
    return h.reshape(B, S, D)


def vae_encode(p, x, key):
    h = conv2d(x, p["conv_in_w"], p["conv_in_b"], 1, 1, "silu")        # 16x16, 32
    d1 = conv2d(h, p["down1_w"], p["down1_b"], 2, 1, "silu")           # 8x8,  32
    d2 = conv2d(d1, p["down2_w"], p["down2_b"], 2, 1, "silu")          # 4x4,  64
    moments = conv2d(d2, p["quant_w"], p["quant_b"], 1, 1)             # 4x4,  8
    mean, logvar = jnp.split(moments, 2, axis=-1)
    logvar = jnp.clip(logvar, -30.0, 20.0)
    eps = jax.random.normal(key, mean.shape, mean.dtype)
    latent = mean + jnp.exp(0.5 * logvar) * eps                        # .sample()
    return latent, [d1, d2]                                            # current_down_blocks


def unet_forward(p, x, t, caption_enc, sample, alpha_prod, inv_scale):
    """Synthetic UNet; returns x_denoised / scaling_factor directly (the 1-step
    scheduler update is fused into the conv_out GEMM epilogue)."""
    B, H, W, _ = x.shape
    # --- timestep embedding (sinusoidal -> MLP) ---
    half = 16
    freqs = jnp.exp(-jnp.log(10000.0) * jnp.arange(half, dtype=jnp.float32) / half)
    args = t.astype(jnp.float32) * freqs
    temb = jnp.concatenate([jnp.sin(args), jnp.cos(args)])[None, :]    # (1, 32)
    temb = pallas_matmul(temb, p["time1_w"], p["time1_b"], activation="silu")
    temb = pallas_matmul(temb, p["time2_w"], p["time2_b"])[0]          # (32,)

    # conv_in.  TwinConv blend skipped: conv_in_pretrained is a deepcopy of
    # conv_in, so x1*(1-r)+x2*r == conv_in(x) exactly.  temb add + SiLU are
    # fused into the GEMM epilogue (t is scalar -> temb is batch-invariant).
    # TODO(synk): reinstate the blend if distinct pretrained conv_in weights are loaded.
    h = conv2d(x, p["conv_in_w"], p["conv_in_b"], 1, 1, "silu", extra_bias=temb)

    # --- one cross-attention block on caption_enc ---
    C = h.shape[-1]
    hs = h.reshape(B, H * W, C)
    q = pallas_matmul(hs.reshape(B * H * W, C), p["q_w"], p["q_b"]).reshape(B, H * W, C)
    Bc, S, Dt = caption_enc.shape
    k = pallas_matmul(caption_enc.reshape(Bc * S, Dt), p["k_w"], p["k_b"]).reshape(Bc, S, C)
    v = pallas_matmul(caption_enc.reshape(Bc * S, Dt), p["v_w"], p["v_b"]).reshape(Bc, S, C)
    attn = pallas_attention(q, k, v)
    # output projection with the residual (hs +) fused into the GEMM epilogue
    h = pallas_matmul(attn.reshape(B * H * W, C), p["o_w"], p["o_b"],
                      residual=hs.reshape(B * H * W, C)).reshape(B, H, W, C)

    # conv_out with sched.step + /scaling_factor fused into the epilogue
    return conv2d(h, p["conv_out_w"], p["conv_out_b"], 1, 1, "sched",
                  residual=sample, alpha_prod=alpha_prod, inv_scale=inv_scale)


def vae_decode(p, z, skips, gamma):
    # TODO(synk): real decoder has 4 skip_convs / up blocks; synthetic model has 2.
    d1, d2 = skips
    h = conv2d(z, p["conv_in_w"], p["conv_in_b"], 1, 1, "silu")        # 4x4, 64
    # gamma folded into the (tiny) 1x1 skip weights; residual add fused in GEMM.
    h = conv2d(d2, p["skip1_w"] * gamma, None, 1, 0, residual=h)       # skip_conv_1
    h = upsample2x(h)
    h = conv2d(h, p["up1_w"], p["up1_b"], 1, 1, "silu")                # 8x8, 32
    h = conv2d(d1, p["skip2_w"] * gamma, None, 1, 0, residual=h)       # skip_conv_2
    h = upsample2x(h)
    h = conv2d(h, p["up2_w"], p["up2_b"], 1, 1, "silu")                # 16x16, 32
    return conv2d(h, p["conv_out_w"], p["conv_out_b"], 1, 1, "clamp")  # .clamp(-1,1) fused


# ----------------------------------------------------------------------------
# Pix2Pix_Turbo.forward
# ----------------------------------------------------------------------------
def pix2pix_turbo_forward(params, c_t, prompt_tokens, deterministic=True,
                          r=1.0, noise_map=None):
    assert prompt_tokens is not None, "prompt path (tokenizer) not supported here"
    x = jnp.transpose(c_t, (0, 2, 3, 1))                               # NCHW -> NHWC

    caption_enc = text_encoder(params["text"], prompt_tokens)

    latent, down_blocks = vae_encode(params["vae_enc"], x, jax.random.PRNGKey(42))
    encoded_control = latent * SCALING_FACTOR

    t = jnp.array(99, jnp.int32)                                       # self.timesteps

    if deterministic:
        unet_input, gamma = encoded_control, 1.0
    else:
        # TODO(synk): LoRA adapter rescaling (set_adapters / set_weights_...) not modeled.
        nm = jnp.transpose(noise_map, (0, 2, 3, 1))
        unet_input = pallas_blend(nm, encoded_control, r)              # nm*(1-r) + enc*r
        gamma = r

    # UNet + sched.step + x_denoised / scaling_factor (fused in conv_out epilogue)
    x_dec_in = unet_forward(params["unet"], unet_input, t, caption_enc,
                            sample=unet_input, alpha_prod=ALPHA_PROD,
                            inv_scale=1.0 / SCALING_FACTOR)

    out = vae_decode(params["vae_dec"], x_dec_in, down_blocks, gamma)  # clamp fused
    return jnp.transpose(out, (0, 3, 1, 2))                            # NHWC -> NCHW


# ----------------------------------------------------------------------------
# Deterministic parameter init (synthetic)
# ----------------------------------------------------------------------------
def init_params(key):
    keys = iter(jax.random.split(key, 64))

    def w(shape, scale=0.05):
        return (scale * jax.random.normal(next(keys), shape)).astype(jnp.float32)

    def z(shape):
        return jnp.zeros(shape, jnp.float32)

    p = {}
    p["text"] = dict(tok_emb=w((100, 32), 0.02), pos_emb=w((8, 32), 0.02),
                     W=w((32, 32)), b=z((32,)))
    p["vae_enc"] = dict(
        conv_in_w=w((32, 3, 3, 3)), conv_in_b=z((32,)),
        down1_w=w((32, 32, 3, 3)), down1_b=z((32,)),
        down2_w=w((64, 32, 3, 3)), down2_b=z((64,)),
        quant_w=w((8, 64, 3, 3)), quant_b=z((8,)),
    )
    p["unet"] = dict(
        conv_in_w=w((32, 4, 3, 3)), conv_in_b=z((32,)),
        time1_w=w((32, 32)), time1_b=z((32,)),
        time2_w=w((32, 32)), time2_b=z((32,)),
        q_w=w((32, 32)), q_b=z((32,)),
        k_w=w((32, 32)), k_b=z((32,)),
        v_w=w((32, 32)), v_b=z((32,)),
        o_w=w((32, 32)), o_b=z((32,)),
        conv_out_w=w((4, 32, 3, 3)), conv_out_b=z((4,)),
    )
    p["vae_dec"] = dict(
        conv_in_w=w((64, 4, 3, 3)), conv_in_b=z((64,)),
        skip1_w=jnp.full((64, 64, 1, 1), 1e-5, jnp.float32),  # constant_(…, 1e-05)
        up1_w=w((32, 64, 3, 3)), up1_b=z((32,)),
        skip2_w=jnp.full((32, 32, 1, 1), 1e-5, jnp.float32),
        up2_w=w((32, 32, 3, 3)), up2_b=z((32,)),
        conv_out_w=w((3, 32, 3, 3)), conv_out_b=z((3,)),
    )
    return p


if __name__ == "__main__":
    root = jax.random.PRNGKey(0)
    kp, k1, k2, k3 = jax.random.split(root, 4)
    params = init_params(kp)

    c_t = jax.random.uniform(k1, (2, 3, 16, 16), jnp.float32, -1.0, 1.0)   # NCHW
    prompt_tokens = jax.random.randint(k2, (2, 8), 0, 100)
    noise_map = jax.random.normal(k3, (2, 4, 4, 4), jnp.float32)           # latent NCHW

    out_det = pix2pix_turbo_forward(params, c_t, prompt_tokens,
                                    deterministic=True, r=1.0)
    out_sto = pix2pix_turbo_forward(params, c_t, prompt_tokens,
                                    deterministic=False, r=0.6, noise_map=noise_map)
    jax.block_until_ready((out_det, out_sto))

    assert out_det.shape == (2, 3, 16, 16) and out_sto.shape == (2, 3, 16, 16)
    assert float(jnp.max(jnp.abs(out_det))) <= 1.0 + 1e-6
    assert float(jnp.max(jnp.abs(out_sto))) <= 1.0 + 1e-6
    print("KERNEL_OK")
</pallas_src>

<mosaic_0001>
module attributes {stable_mosaic.version = 11 : i64} {
  func.func @_mm_kernel(%arg0: i32, %arg1: i32, %arg2: i32, %arg3: memref<16x32xbf16, #tpu.memory_space<vmem>>, %arg4: memref<32x128xbf16, #tpu.memory_space<vmem>>, %arg5: memref<1x128xf32, #tpu.memory_space<vmem>>, %arg6: memref<16x128xf32, #tpu.memory_space<vmem>>, %arg7: memref<16x128xf32, #tpu.memory_space<vmem>>) attributes {dimension_semantics = [#tpu.dimension_semantics<parallel>, #tpu.dimension_semantics<parallel>, #tpu.dimension_semantics<arbitrary>], iteration_bounds = array<i64: 1, 1, 1>, scalar_prefetch = 0 : i64, scratch_operands = 1 : i64, tpu.core_type = #tpu.core_type<tc>, window_params = [{transform_indices = @transform_0, window_bounds = array<i64: 16, 32>}, {transform_indices = @transform_1, window_bounds = array<i64: 32, 128>}, {transform_indices = @transform_2, window_bounds = array<i64: 1, 128>}, {transform_indices = @transform_3, window_bounds = array<i64: 16, 128>}]} {
    %c0_i32 = arith.constant 0 : i32
    %0 = arith.cmpi eq, %arg2, %c0_i32 : i32
    %1 = arith.extui %0 : i1 to i32
    %c0_i32_0 = arith.constant 0 : i32
    %2 = arith.cmpi ne, %1, %c0_i32_0 : i32
    scf.if %2 {
      %cst_10 = arith.constant 0.000000e+00 : f32
      %12 = vector.broadcast %cst_10 : f32 to vector<16x128xf32>
      %c0_11 = arith.constant 0 : index
      %c0_12 = arith.constant 0 : index
      %13 = vector.load %arg7[%c0_11, %c0_12] : memref<16x128xf32, #tpu.memory_space<vmem>>, vector<16x128xf32>
      tpu.vector_store %arg7[%c0_11, %c0_12], %12 {strides = array<i32>} : memref<16x128xf32, #tpu.memory_space<vmem>>, vector<16x128xf32>,
    } else {
    }
    %c0 = arith.constant 0 : index
    %c0_1 = arith.constant 0 : index
    %3 = vector.load %arg7[%c0, %c0_1] : memref<16x128xf32, #tpu.memory_space<vmem>>, vector<16x128xf32>
    %c0_2 = arith.constant 0 : index
    %c0_3 = arith.constant 0 : index
    %4 = vector.load %arg3[%c0_2, %c0_3] : memref<16x32xbf16, #tpu.memory_space<vmem>>, vector<16x32xbf16>
    %c0_4 = arith.constant 0 : index
    %c0_5 = arith.constant 0 : index
    %5 = vector.load %arg4[%c0_4, %c0_5] : memref<32x128xbf16, #tpu.memory_space<vmem>>, vector<32x128xbf16>
    %cst = arith.constant dense<0.000000e+00> : vector<16x128xf32>
    %6 = tpu.matmul %4, %5, %cst {dimension_numbers = #tpu.dot_dimension_numbers<[1], [0], [0], [1], [0, 0, 1, 1], [], []>} : vector<16x32xbf16>, vector<32x128xbf16>, vector<16x128xf32> -> vector<16x128xf32>
    %7 = arith.addf %3, %6 : vector<16x128xf32>
    %c0_6 = arith.constant 0 : index
    %c0_7 = arith.constant 0 : index
    %8 = vector.load %arg7[%c0_6, %c0_7] : memref<16x128xf32, #tpu.memory_space<vmem>>, vector<16x128xf32>
    tpu.vector_store %arg7[%c0_6, %c0_7], %7 {strides = array<i32>} : memref<16x128xf32, #tpu.memory_space<vmem>>, vector<16x128xf32>,
    %c0_i32_8 = arith.constant 0 : i32
    %9 = arith.cmpi eq, %arg2, %c0_i32_8 : i32
    %10 = arith.extui %9 : i1 to i32
    %c0_i32_9 = arith.constant 0 : i32
    %11 = arith.cmpi ne, %10, %c0_i32_9 : i32
    scf.if %11 {
      %c0_10 = arith.constant 0 : index
      %c0_11 = arith.constant 0 : index
      %12 = vector.load %arg7[%c0_10, %c0_11] : memref<16x128xf32, #tpu.memory_space<vmem>>, vector<16x128xf32>
      %c0_12 = arith.constant 0 : index
      %c0_13 = arith.constant 0 : index
      %13 = vector.load %arg5[%c0_12, %c0_13] : memref<1x128xf32, #tpu.memory_space<vmem>>, vector<1x128xf32>
      %14 = vector.broadcast %13 : vector<1x128xf32> to vector<16x128xf32>
      %15 = arith.addf %12, %14 : vector<16x128xf32>
      %c0_14 = arith.constant 0 : index
      %c0_15 = arith.constant 0 : index
      %16 = vector.load %arg6[%c0_14, %c0_15] : memref<16x128xf32, #tpu.memory_space<vmem>>, vector<16x128xf32>
      tpu.vector_store %arg6[%c0_14, %c0_15], %15 {strides = array<i32>} : memref<16x128xf32, #tpu.memory_space<vmem>>, vector<16x128xf32>,
    } else {
    }
    return
  }
  func.func @transform_0(%arg0: i32, %arg1: i32, %arg2: i32) -> (i32, i32) {
    %c0_i32 = arith.constant 0 : i32
    return %arg0, %arg2 : i32, i32
  }
  func.func @transform_1(%arg0: i32, %arg1: i32, %arg2: i32) -> (i32, i32) {
    %c0_i32 = arith.constant 0 : i32
    return %arg2, %arg1 : i32, i32
  }
  func.func @transform_2(%arg0: i32, %arg1: i32, %arg2: i32) -> (i32, i32) {
    %c0_i32 = arith.constant 0 : i32
    %c0_i32_0 = arith.constant 0 : i32
    return %c0_i32, %arg1 : i32, i32
  }
  func.func @transform_3(%arg0: i32, %arg1: i32, %arg2: i32) -> (i32, i32) {
    %c0_i32 = arith.constant 0 : i32
    return %arg0, %arg1 : i32, i32
  }
}

</mosaic_0001>

<bundles_post_ra>
// kernel: tpu_custom_call.1
= control target key start
LH: loop header
LB: loop body
LE: loop exit
PB: predicated region body
PF: predicated region fallthrough
CT: control target
= control target key end

     0   :  { %8 = vsyncpa [#allocation4], 0  ;;  %s326_s0 = inlined_call_operand.hbm [shape: bf16[16,32], index: 0, kind: input, shape index: {}]   ;;  %s327_s1 = inlined_call_operand.hbm [shape: bf16[32,128], index: 1, kind: input, shape index: {}]   ;;  %s328_s2 = inlined_call_operand.vmem [shape: f32[1,128], index: 2, kind: input, shape index: {}]   ;;  %s329_s3 = inlined_call_operand.hbm [shape: f32[16,128], index: 3, kind: output, shape index: {}]  }
   0x1   :  { %9 = vsyncpa [#allocation7], 0 }
   0x2   :  { %10 = vsyncpa [#allocation5], 0  ;;  %s258_s12 = smov [#allocation3]   ;;  %s186_s16 = scalar_lea.hbm %s326_s0, 128 }
   0x3   :  { %s16_s13 = sshll.u32 %s258_s12, 4  ;;  %p187_p0 = scmp.ne.s32.totalorder %s326_s0, %s186_s16  ;;  %s17_s13 = int_to_ptr.vmem [resolvable:$true] %s16_s13 }
   0x4   :  { %p190_p1 = scmp.lt.u32.totalorder %s186_s16, %s326_s0 }
   0x6   :  { %p192_p2 = pnand %p190_p1, %p187_p0 }
   0x8   :  { %195 = shalt.err (!%p192_p2)
}
   0x9   :  { %s196_s21 = scalar_lea.vmem %s17_s13, 128  ;;  %p201_p4 = scmp.lt.s32.totalorder %s17_s13, %s17_s13 }
   0xa   :  { %p197_p3 = scmp.ne.s32.totalorder %s17_s13, %s196_s21  ;;  %p202_p5 = scmp.lt.s32.totalorder %s196_s21, %s196_s21 }
   0xc   :  { %p203_p6 = por %p202_p5, %p201_p4 }
   0xe   :  { %p204_p7 = pnand %p203_p6, %p197_p3 }
  0x10   :  { %207 = shalt.err (!%p204_p7)
}
  0x11   :  { %s259_s22 = smov 64   ;;  %s260_s23 = smov 4  }
  0x12   :  { %22 = dma.hbm_to_vmem [thread:$0]  %s326_s0, 128, %s17_s13, [#allocation4], %s259_s22, %s259_s22, %s260_s23  }
  0x13   :  { %s261_s26 = smov [#allocation6]   ;;  %s208_s30 = scalar_lea.hbm %s327_s1, 256 }
  0x14   :  { %s28_s27 = sshll.u32 %s261_s26, 4  ;;  %p209_p8 = scmp.ne.s32.totalorder %s327_s1, %s208_s30  ;;  %s29_s27 = int_to_ptr.vmem [resolvable:$true] %s28_s27 }
  0x15   :  { %p212_p9 = scmp.lt.u32.totalorder %s208_s30, %s327_s1 }
  0x17   :  { %p214_p10 = pnand %p212_p9, %p209_p8 }
  0x19   :  { %217 = shalt.err (!%p214_p10)
}
  0x1a   :  { %s218_s8 = scalar_lea.vmem %s29_s27, 256  ;;  %p223_p12 = scmp.lt.s32.totalorder %s29_s27, %s29_s27 }
  0x1b   :  { %p219_p11 = scmp.ne.s32.totalorder %s29_s27, %s218_s8  ;;  %p224_p13 = scmp.lt.s32.totalorder %s218_s8, %s218_s8 }
  0x1d   :  { %p225_p0 = por %p224_p13, %p223_p12 }
  0x1f   :  { %p226_p1 = pnand %p225_p0, %p219_p11 }
  0x21   :  { %229 = shalt.err (!%p226_p1)
}
  0x22   :  { %34 = dma.hbm_to_vmem [thread:$0]  %s327_s1, 256, %s29_s27, [#allocation7], %s259_s22, %s259_s22, %s260_s23  }
  0x23   :  { %252 = dma.done.wait [#allocation4], 128  }
  0x24   :  { %253 = vsyncadd [#allocation4], 4294967168 }
  0x25   :  { %254 = dma.done.wait [#allocation7], 256  }
  0x26   :  { %255 = vsyncadd [#allocation7], 4294967040  ;;  %v262_v0 = vmov 0.0   ;;  %vm263_vm0 = vmmov 0   ;;  %v183_v1 = vld [vmem:[#allocation6] sm:$0xff]   ;;  %v184_v2 = vld [vmem:[#allocation6 + $0x8] sm:$0xff]  }
  0x27   :  { %166 = vmatprep.subr.bf16.mxu0 %v262_v0  ;;  %170 = vmatprep.mubr.msk.bf16.mxu0 %vm263_vm0, %v262_v0  ;;  %v185_v3 = vld [vmem:[#allocation3] sm:$0xff]   ;;  %vm75_vm1 = vcmask 261120   ;;  %s264_s1 = smov [#allocation8]  }
  0x28   :  { %167 = vmatpush3.bf16.msra.mxu0 %v183_v1  ;;  %v162_v4 = vld [vmem:[%s328_s2] ss:$0 sm:$0xff]  ;;  %s145_s12 = sshll.u32 %s264_s1, 4  ;;  %s146_s12 = int_to_ptr.vmem [resolvable:$true] %s145_s12 }
  0x29   :  { %168 = vmatprep.subr.bf16.mxu0 %v262_v0  ;;  %s230_s13 = scalar_lea.vmem %s146_s12, 256  ;;  %p235_p3 = scmp.lt.s32.totalorder %s146_s12, %s146_s12 }
  0x2a   :  { %p231_p2 = scmp.ne.s32.totalorder %s146_s12, %s230_s13  ;;  %p236_p4 = scmp.lt.s32.totalorder %s230_s13, %s230_s13 }
  0x2c   :  { %169 = vmatpush3.bf16.msra.mxu0 %v184_v2  ;;  %p237_p5 = por %p236_p4, %p235_p3 }
  0x2e   :  { %p238_p6 = pnand %p237_p5, %p231_p2 }
  0x2f   :  { %171 = vmatmul.mubr.msk.bf16.vlgmr.msra.gmra.mrb[0].mxu0 %vm75_vm1, %v185_v3 }
 0x102   :  { %v113_v5 = vpop.f32.mrb[0].mxu0 }
 0x103   :  { %v136_v6 = vadd.f32 %v162_v4, %v113_v5  ;;  %v172_v7 = vpop.f32.mrb[1].mxu0 }
 0x104   :  { %v116_v8 = vpop.f32.mrb[2].mxu0 }
 0x105   :  { %138 = vst [vmem:[#allocation8] sm:$0xff] %v136_v6  ;;  %v137_v9 = vadd.f32 %v162_v4, %v116_v8  ;;  %v173_v10 = vpop.f32.mrb[3].mxu0 }
 0x107   :  { %139 = vst [vmem:[#allocation8 + $0x8] sm:$0xff] %v137_v9 }
 0x108   :  { %241 = shalt.err (!%p238_p6)
}
 0x109   :  { %s242_s15 = scalar_lea.hbm %s329_s3, 256 }
 0x10a   :  { %p243_p7 = scmp.ne.s32.totalorder %s329_s3, %s242_s15  ;;  %p246_p8 = scmp.lt.u32.totalorder %s242_s15, %s329_s3 }
 0x10c   :  { %p248_p9 = pnand %p246_p8, %p243_p7 }
 0x10e   :  { %251 = shalt.err (!%p248_p9)
}
 0x10f   :  { %s265_s20 = smov 128   ;;  %s266_s21 = smov 8  }
 0x110   :  { %151 = dma.vmem_to_hbm [thread:$0]  %s146_s12, 256, %s329_s3, [#allocation5], %s265_s20, %s265_s20, %s266_s21  }
 0x111   :  { %256 = dma.done.wait [#allocation5], 256  }
 0x112   :  { %257 = vsyncadd [#allocation5], 4294967040 }
 0x113   :  { %155 = vsyncpa [#allocation4], 1 }
 0x114   :  { %156 = vsyncpa [#allocation7], 1 }
 0x115   :  { %157 = vsyncpa [#allocation5], 1 }

</bundles_post_ra>
